<compile_context>
chip_gen: v7x
topology: tpu7x:2x2x1
jax: 0.10.0
libtpu: 0.0.40
codegen_flags: <defaults>
</compile_context>

<pallas_src>
import functools

import jax
import jax.numpy as jnp
from jax.experimental import pallas as pl
from jax.experimental.pallas import tpu as pltpu

LANE = 128
TILE_TARGET = 8192   # spatial tile width (lanes); ~128 KiB per class in f32
SMOOTH = 1e-5


def _dice_kernel(score_ref, lbl_ref, out_ref, acc_ref, *,
                 n_classes, apply_softmax, needs_mask):
    t = pl.program_id(1)
    nt = pl.num_programs(1)

    @pl.when(t == 0)
    def _():
        acc_ref[...] = jnp.zeros_like(acc_ref)

    s = score_ref[0]                     # (C, TILE) f32
    lbl = lbl_ref[0]                     # (1, TILE) i32  (padding = -1)

    if apply_softmax:
        # Fused softmax over the class axis (all classes resident per tile).
        s_max = jnp.max(s, axis=0, keepdims=True)
        e = jnp.exp(s - s_max)
        s = e / jnp.sum(e, axis=0, keepdims=True)
        if needs_mask:
            # Padded columns would otherwise contribute 1/C per class to z_sum
            # after softmax; zero them out (label sentinel is -1).
            s = s * (lbl >= 0).astype(jnp.float32)

    cls = jax.lax.broadcasted_iota(jnp.int32, (n_classes, s.shape[-1]), 0)
    onehot = (lbl == cls).astype(jnp.float32)        # (C, TILE)

    acc_ref[0] += s * onehot     # intersect partials
    acc_ref[1] += s * s          # z_sum partials
    acc_ref[2] += onehot         # y_sum partials (onehot * onehot == onehot)

    @pl.when(t == nt - 1)
    def _():
        out_ref[0] = jnp.sum(acc_ref[...], axis=-1)  # (3, C) per-batch sums


def dice_loss_pallas(inputs, target, n_classes, weight=None, softmax=False):
    """Matches DiceLoss(n_classes).forward(inputs, target, weight, softmax).

    `n_classes`, `weight` and `softmax` must be static (Python) values; bind
    them with functools.partial before jit.
    """
    B, C, H, W = inputs.shape
    assert C == n_classes, "channel dim must equal n_classes"
    assert target.shape == (B, H, W)

    HW = H * W
    hw_lane = ((HW + LANE - 1) // LANE) * LANE
    TILE = min(TILE_TARGET, hw_lane)
    HW_pad = ((HW + TILE - 1) // TILE) * TILE
    NT = HW_pad // TILE

    # Pure (no-copy) reshapes -- no class-major transpose.
    score = inputs.astype(jnp.float32).reshape(B, C, HW)
    labels = target.astype(jnp.int32).reshape(B, 1, HW)
    if HW_pad != HW:  # pad only when necessary; jnp.pad costs a full copy
        pad = HW_pad - HW
        score = jnp.pad(score, ((0, 0), (0, 0), (0, pad)))
        labels = jnp.pad(labels, ((0, 0), (0, 0), (0, pad)),
                         constant_values=-1)

    kernel = functools.partial(
        _dice_kernel,
        n_classes=n_classes,
        apply_softmax=bool(softmax),
        needs_mask=(HW_pad != HW),
    )

    partials = pl.pallas_call(
        kernel,
        out_shape=jax.ShapeDtypeStruct((B, 3, C), jnp.float32),
        grid_spec=pltpu.PrefetchScalarGridSpec(
            num_scalar_prefetch=0,
            grid=(B, NT),
            in_specs=[
                pl.BlockSpec((1, C, TILE), lambda b, t: (b, 0, t)),  # score
                pl.BlockSpec((1, 1, TILE), lambda b, t: (b, 0, t)),  # labels
            ],
            out_specs=pl.BlockSpec((1, 3, C), lambda b, t: (b, 0, 0)),
            scratch_shapes=[pltpu.VMEM((3, C, TILE), jnp.float32)],
        ),
        compiler_params=pltpu.CompilerParams(
            dimension_semantics=("parallel", "arbitrary")),
    )(score, labels)

    # Tiny finalize in JAX (B*3*C scalars): combine across batch, dice, weights.
    sums = jnp.sum(partials, axis=0)                 # (3, C)
    intersect, z_sum, y_sum = sums[0], sums[1], sums[2]
    dice = 1.0 - (2.0 * intersect + SMOOTH) / (z_sum + y_sum + SMOOTH)

    if weight is None:
        weight = [1.0] * n_classes
    weight = jnp.asarray(weight, jnp.float32)
    return jnp.sum(dice * weight) / n_classes


def dice_loss_ref(inputs, target, n_classes, weight=None, softmax=False):
    """Pure-JAX reference matching the PyTorch module semantics."""
    inputs = inputs.astype(jnp.float32)
    if softmax:
        inputs = jax.nn.softmax(inputs, axis=1)
    onehot = jax.nn.one_hot(target, n_classes, axis=1, dtype=jnp.float32)
    if weight is None:
        weight = [1.0] * n_classes
    loss = 0.0
    for i in range(n_classes):
        s = inputs[:, i]
        t = onehot[:, i]
        intersect = jnp.sum(s * t)
        y_sum = jnp.sum(t * t)
        z_sum = jnp.sum(s * s)
        dice = 1.0 - (2.0 * intersect + SMOOTH) / (z_sum + y_sum + SMOOTH)
        loss = loss + dice * weight[i]
    return loss / n_classes


if __name__ == "__main__":
    B, C, H, W = 2, 4, 16, 16
    key = jax.random.PRNGKey(0)
    k_in, k_tgt = jax.random.split(key)
    inputs = jax.random.uniform(k_in, (B, C, H, W), dtype=jnp.float32)
    target = jax.random.randint(k_tgt, (B, H, W), 0, C, dtype=jnp.int32)

    # Static flags are bound BEFORE jit (fixes TracerBoolConversionError).
    fn_plain = jax.jit(functools.partial(dice_loss_pallas, n_classes=C,
                                         softmax=False))
    fn_soft = jax.jit(functools.partial(dice_loss_pallas, n_classes=C,
                                        softmax=True))
    fn_wsoft = jax.jit(functools.partial(dice_loss_pallas, n_classes=C,
                                         weight=[0.5, 1.0, 1.5, 2.0],
                                         softmax=True))

    out = jax.block_until_ready(fn_plain(inputs, target))
    ref = dice_loss_ref(inputs, target, C, softmax=False)
    assert jnp.allclose(out, ref, rtol=1e-4, atol=1e-5), (out, ref)

    out_s = jax.block_until_ready(fn_soft(inputs, target))
    ref_s = dice_loss_ref(inputs, target, C, softmax=True)
    assert jnp.allclose(out_s, ref_s, rtol=1e-4, atol=1e-5), (out_s, ref_s)

    out_w = jax.block_until_ready(fn_wsoft(inputs, target))
    ref_w = dice_loss_ref(inputs, target, C, weight=[0.5, 1.0, 1.5, 2.0],
                          softmax=True)
    assert jnp.allclose(out_w, ref_w, rtol=1e-4, atol=1e-5), (out_w, ref_w)

    print("KERNEL_OK")
</pallas_src>

<mosaic_0001>
module attributes {stable_mosaic.version = 11 : i64} {
  func.func @_dice_kernel(%arg0: i32, %arg1: i32, %arg2: memref<1x4x256xf32, #tpu.memory_space<vmem>>, %arg3: memref<1x1x256xi32, #tpu.memory_space<vmem>>, %arg4: memref<1x3x4xf32, #tpu.memory_space<vmem>>, %arg5: memref<3x4x256xf32, #tpu.memory_space<vmem>>) attributes {dimension_semantics = [#tpu.dimension_semantics<parallel>, #tpu.dimension_semantics<arbitrary>], iteration_bounds = array<i64: 2, 1>, scalar_prefetch = 0 : i64, scratch_operands = 1 : i64, tpu.core_type = #tpu.core_type<tc>, window_params = [{transform_indices = @transform_0, window_bounds = array<i64: 1, 4, 256>}, {transform_indices = @transform_1, window_bounds = array<i64: 1, 1, 256>}, {transform_indices = @transform_2, window_bounds = array<i64: 1, 3, 4>}]} {
    %c0_i32 = arith.constant 0 : i32
    %0 = arith.cmpi eq, %arg1, %c0_i32 : i32
    %1 = arith.extui %0 : i1 to i32
    %c0_i32_0 = arith.constant 0 : i32
    %2 = arith.cmpi ne, %1, %c0_i32_0 : i32
    scf.if %2 {
      %cst = arith.constant 0.000000e+00 : f32
      %35 = vector.broadcast %cst : f32 to vector<3x4x256xf32>
      %c0_24 = arith.constant 0 : index
      %c0_25 = arith.constant 0 : index
      %c0_26 = arith.constant 0 : index
      %36 = vector.load %arg5[%c0_24, %c0_25, %c0_26] : memref<3x4x256xf32, #tpu.memory_space<vmem>>, vector<3x4x256xf32>
      tpu.vector_store %arg5[%c0_24, %c0_25, %c0_26], %35 {strides = array<i32>} : memref<3x4x256xf32, #tpu.memory_space<vmem>>, vector<3x4x256xf32>,
    } else {
    }
    %c0 = arith.constant 0 : index
    %c0_1 = arith.constant 0 : index
    %c0_2 = arith.constant 0 : index
    %3 = vector.load %arg2[%c0, %c0_1, %c0_2] : memref<1x4x256xf32, #tpu.memory_space<vmem>>, vector<1x4x256xf32>
    %4 = vector.shape_cast %3 : vector<1x4x256xf32> to vector<4x256xf32>
    %c0_3 = arith.constant 0 : index
    %c0_4 = arith.constant 0 : index
    %c0_5 = arith.constant 0 : index
    %5 = vector.load %arg3[%c0_3, %c0_4, %c0_5] : memref<1x1x256xi32, #tpu.memory_space<vmem>>, vector<1x1x256xi32>
    %6 = vector.shape_cast %5 : vector<1x1x256xi32> to vector<1x256xi32>
    %7 = tpu.iota {dimensions = array<i32: 0>} : vector<4x256xi32>
    %8 = vector.broadcast %6 : vector<1x256xi32> to vector<4x256xi32>
    %9 = arith.cmpi eq, %8, %7 : vector<4x256xi32>
    %10 = arith.extui %9 : vector<4x256xi1> to vector<4x256xi32>
    %11 = arith.sitofp %10 : vector<4x256xi32> to vector<4x256xf32>
    %c0_6 = arith.constant 0 : index
    %c0_7 = arith.constant 0 : index
    %c0_8 = arith.constant 0 : index
    %12 = vector.load %arg5[%c0_6, %c0_7, %c0_8] : memref<3x4x256xf32, #tpu.memory_space<vmem>>, vector<1x4x256xf32>
    %13 = vector.shape_cast %12 : vector<1x4x256xf32> to vector<4x256xf32>
    %14 = arith.mulf %4, %11 : vector<4x256xf32>
    %15 = arith.addf %13, %14 : vector<4x256xf32>
    %c0_9 = arith.constant 0 : index
    %c0_10 = arith.constant 0 : index
    %c0_11 = arith.constant 0 : index
    %16 = vector.load %arg5[%c0_9, %c0_10, %c0_11] : memref<3x4x256xf32, #tpu.memory_space<vmem>>, vector<1x4x256xf32>
    %17 = vector.shape_cast %16 : vector<1x4x256xf32> to vector<4x256xf32>
    %18 = vector.shape_cast %15 : vector<4x256xf32> to vector<1x4x256xf32>
    tpu.vector_store %arg5[%c0_9, %c0_10, %c0_11], %18 {strides = array<i32>} : memref<3x4x256xf32, #tpu.memory_space<vmem>>, vector<1x4x256xf32>,
    %c1 = arith.constant 1 : index
    %c0_12 = arith.constant 0 : index
    %c0_13 = arith.constant 0 : index
    %19 = vector.load %arg5[%c1, %c0_12, %c0_13] : memref<3x4x256xf32, #tpu.memory_space<vmem>>, vector<1x4x256xf32>
    %20 = vector.shape_cast %19 : vector<1x4x256xf32> to vector<4x256xf32>
    %21 = arith.mulf %4, %4 : vector<4x256xf32>
    %22 = arith.addf %20, %21 : vector<4x256xf32>
    %c1_14 = arith.constant 1 : index
    %c0_15 = arith.constant 0 : index
    %c0_16 = arith.constant 0 : index
    %23 = vector.load %arg5[%c1_14, %c0_15, %c0_16] : memref<3x4x256xf32, #tpu.memory_space<vmem>>, vector<1x4x256xf32>
    %24 = vector.shape_cast %23 : vector<1x4x256xf32> to vector<4x256xf32>
    %25 = vector.shape_cast %22 : vector<4x256xf32> to vector<1x4x256xf32>
    tpu.vector_store %arg5[%c1_14, %c0_15, %c0_16], %25 {strides = array<i32>} : memref<3x4x256xf32, #tpu.memory_space<vmem>>, vector<1x4x256xf32>,
    %c2 = arith.constant 2 : index
    %c0_17 = arith.constant 0 : index
    %c0_18 = arith.constant 0 : index
    %26 = vector.load %arg5[%c2, %c0_17, %c0_18] : memref<3x4x256xf32, #tpu.memory_space<vmem>>, vector<1x4x256xf32>
    %27 = vector.shape_cast %26 : vector<1x4x256xf32> to vector<4x256xf32>
    %28 = arith.addf %27, %11 : vector<4x256xf32>
    %c2_19 = arith.constant 2 : index
    %c0_20 = arith.constant 0 : index
    %c0_21 = arith.constant 0 : index
    %29 = vector.load %arg5[%c2_19, %c0_20, %c0_21] : memref<3x4x256xf32, #tpu.memory_space<vmem>>, vector<1x4x256xf32>
    %30 = vector.shape_cast %29 : vector<1x4x256xf32> to vector<4x256xf32>
    %31 = vector.shape_cast %28 : vector<4x256xf32> to vector<1x4x256xf32>
    tpu.vector_store %arg5[%c2_19, %c0_20, %c0_21], %31 {strides = array<i32>} : memref<3x4x256xf32, #tpu.memory_space<vmem>>, vector<1x4x256xf32>,
    %c0_i32_22 = arith.constant 0 : i32
    %32 = arith.cmpi eq, %arg1, %c0_i32_22 : i32
    %33 = arith.extui %32 : i1 to i32
    %c0_i32_23 = arith.constant 0 : i32
    %34 = arith.cmpi ne, %33, %c0_i32_23 : i32
    scf.if %34 {
      %c0_24 = arith.constant 0 : index
      %c0_25 = arith.constant 0 : index
      %c0_26 = arith.constant 0 : index
      %35 = vector.load %arg5[%c0_24, %c0_25, %c0_26] : memref<3x4x256xf32, #tpu.memory_space<vmem>>, vector<3x4x256xf32>
      %cst = arith.constant dense<0.000000e+00> : vector<3x4xf32>
      %36 = vector.multi_reduction <add>, %35, %cst [2] : vector<3x4x256xf32> to vector<3x4xf32>
      %c0_27 = arith.constant 0 : index
      %c0_28 = arith.constant 0 : index
      %c0_29 = arith.constant 0 : index
      %37 = vector.load %arg4[%c0_27, %c0_28, %c0_29] : memref<1x3x4xf32, #tpu.memory_space<vmem>>, vector<1x3x4xf32>
      %38 = vector.shape_cast %37 : vector<1x3x4xf32> to vector<3x4xf32>
      %39 = vector.shape_cast %36 : vector<3x4xf32> to vector<1x3x4xf32>
      tpu.vector_store %arg4[%c0_27, %c0_28, %c0_29], %39 {strides = array<i32>} : memref<1x3x4xf32, #tpu.memory_space<vmem>>, vector<1x3x4xf32>,
    } else {
    }
    return
  }
  func.func @transform_0(%arg0: i32, %arg1: i32) -> (i32, i32, i32) {
    %c0_i32 = arith.constant 0 : i32
    %c0_i32_0 = arith.constant 0 : i32
    return %arg0, %c0_i32, %arg1 : i32, i32, i32
  }
  func.func @transform_1(%arg0: i32, %arg1: i32) -> (i32, i32, i32) {
    %c0_i32 = arith.constant 0 : i32
    %c0_i32_0 = arith.constant 0 : i32
    return %arg0, %c0_i32, %arg1 : i32, i32, i32
  }
  func.func @transform_2(%arg0: i32, %arg1: i32) -> (i32, i32, i32) {
    %c0_i32 = arith.constant 0 : i32
    %c0_i32_0 = arith.constant 0 : i32
    %c0_i32_1 = arith.constant 0 : i32
    return %arg0, %c0_i32, %c0_i32_0 : i32, i32, i32
  }
}

</mosaic_0001>

<bundles_post_ra>
// kernel: dice_loss_pallas.1
= control target key start
LH: loop header
LB: loop body
LE: loop exit
PB: predicated region body
PF: predicated region fallthrough
CT: control target
= control target key end

     0   :  { %s462_s9 = smov 0   ;;  %s464_s10 = smov 0   ;;  %s503_s0 = inlined_call_operand.vmem [shape: f32[2,4,256], index: 0, kind: input, shape index: {}]   ;;  %s504_s1 = inlined_call_operand.vmem [shape: s32[2,1,256], index: 1, kind: input, shape index: {}]   ;;  %s505_s2 = inlined_call_operand.vmem [shape: f32[2,3,4], index: 2, kind: output, shape index: {}]  }
   0x1   :  { %s466_s11 = smov 0  }
   0x2 LB: > { %s24_s12 = sadd.s32 1, %s440_s10  ;;  %p386_p0 = scmp.ge.s32.totalorder %s444_s11, 1  ;;  %s444_s11 = sphi %s466_s11, %s12_s11   ;;  %s440_s10 = sphi %s464_s10, %s507_s10   ;;  %s436_s9 = sphi %s462_s9, %s506_s9  }
   0x3   : > { %p26_p1 = scmp.ge.s32.totalorder %s24_s12, 2  ;;  %p147_p2 = scmp.lt.s32.totalorder %s444_s11, 3 }
   0x5   : > { %s509_s12 = smov (%p26_p1, %s24_s12), 0  ;;  %p148_p3 = pnand %p386_p0, %p147_p2 }
   0x6   : > { %p181_p4 = scmp.lt.s32.totalorder (!%p148_p3), %s436_s9, 1  ;;  %v212_v0 = vlaneseq (!%p148_p3)  ;;  %v446_v11 = vmov (!%p148_p3), 0.0   ;;  %vm260_vm2 = vcmask (!%p148_p3), 1043456   ;;  %vm293_vm3 = vcmask (!%p148_p3), 1041409  }
   0x7   : > { %151 = sbr.rel (%p148_p3) target bundleno = 182 (0xb6), region = 28  ;;  %vm295_vm4 = vcmask (!%p148_p3), 1042434   ;;  %vm298_vm5 = vcmask (!%p148_p3), 26624  }
   0x8   : > { %v213_v1 = vshrl.u32 (!%p148_p3), %v212_v0, 7  ;;  %v280_v2 = vand.u32 (!%p148_p3), 127, %v212_v0 }
   0xa   : > { %v216_v3 = vsub.s32 (!%p148_p3), 0, %v213_v1  ;;  %v220_v4 = vsub.s32 (!%p148_p3), 1, %v213_v1  ;;  %v283_v5 = vsub.s32 (!%p148_p3), %v280_v2, %v213_v1 }
   0xe   : > { %s511_s9 = smov (!%p181_p4, %s436_s9), 1 }
   0xf   : > { %s395_s13 = sshll.u32 %s511_s9, 3  ;;  %s389_s14 = sshll.u32 %s511_s9, 1 }
  0x10   : > { %s188_s17 = scalar_lea.vmem %s503_s0, %s395_s13  ;;  %s197_s20 = scalar_lea.vmem %s504_s1, %s389_s14 }
  0x11   : > { %v211_v6 = vld [vmem:[%s197_s20] sm:$0x3]  ;;  %s390_s21 = sshll.u32 %s511_s9, 2 }
  0x12   : > { %v217_v7 = vrot.slane %v211_v6, %v216_v3  ;;  %v221_v8 = vrot.slane %v211_v6, %v220_v4  ;;  %v210_v9 = vld [vmem:[%s188_s17] sm:$0xff]  ;;  %s202_s24 = scalar_lea.vmem %s505_s2, %s390_s21 }
  0x13   : > { %v238_v10 = vmul.f32 %v210_v9, %v210_v9 }
  0x14   : > { %vm222_vm0 = vcmp.eq.s32.totalorder %v217_v7, %v213_v1  ;;  %vm223_vm1 = vcmp.eq.s32.totalorder %v221_v8, %v213_v1 }
  0x15   : > { %v391_v12 = vsel %vm222_vm0, 1.0, %v446_v11  ;;  %v392_v13 = vsel %vm223_vm1, 1.0, %v446_v11  ;;  %v255_v17 = vcombine.high %v238_v10, %v238_v10  ;;  %v266_v24 = vsel %vm260_vm2, %v238_v10, 0.0 }
  0x16   : > { %v231_v14 = vcombine.low %v391_v12, %v392_v13  ;;  %v396_v15 = vcombine.low %v392_v13, %v392_v13 }
  0x17   : > { %v267_v25 = vsel %vm260_vm2, %v255_v17, 0.0 }
  0x18   : > { %v233_v16 = vmul.f32 %v231_v14, %v210_v9  ;;  %v271_v18 = vsel %vm260_vm2, %v231_v14, 0.0  ;;  %v272_v19 = vsel %vm260_vm2, %v396_v15, 0.0  ;;  %v268_v27 = vadd.f32 %v267_v25, %v266_v24 }
  0x19   : > { %v273_v20 = vadd.f32 %v272_v19, %v271_v18 }
  0x1a   : > { %v254_v21 = vcombine.high %v233_v16, %v233_v16  ;;  %v261_v22 = vsel %vm260_vm2, %v233_v16, 0.0 }
  0x1b   : > { %274 = vadd.xlane.f32.xlu1 %v273_v20 }
  0x1c   : > { %v262_v23 = vsel %vm260_vm2, %v254_v21, 0.0 }
  0x1d   : > { %v263_v26 = vadd.f32 %v262_v23, %v261_v22 }
  0x1f   : > { %264 = vadd.xlane.f32.xlu0 %v263_v26 }
  0x23   : > { %269 = vadd.xlane.f32.xlu0 %v268_v27 }
  0xa8   : > { %v275_v29 = vpop.xlane.xlu1 %274 }
  0xa9   : > { %v292_v31 = vrot.slane %v275_v29, %v283_v5 }
  0xac   : > { %v265_v28 = vpop.xlane.xlu0 %264 }
  0xad   : > { %v284_v32 = vrot.slane %v265_v28, %v283_v5 }
  0xb0   : > { %v270_v30 = vpop.xlane.xlu0 %269 }
  0xb1   : > { %v288_v33 = vrot.slane %v270_v30, %v283_v5 }
  0xb3   : > { %v294_v34 = vsel %vm293_vm3, %v288_v33, %v284_v32 }
  0xb4   : > { %v296_v35 = vsel %vm295_vm4, %v292_v31, %v294_v34 }
  0xb5   : > { %299 = vst.msk [vmem:[%s202_s24] sm:$0x7] %vm298_vm5, %v296_v35 }
  0xb6 PF: > { %s12_s11 = sadd.s32 1, %s444_s11   ;;  %s506_s9 = smov %s440_s10 }
  0xb7   : > { %p9_p5 = scmp.ge.s32.totalorder %s12_s11, 4   ;;  %s507_s10 = smov %s509_s12 }
  0xb9   :  { %11 = sbr.rel (!%p9_p5) target bundleno = 2 (0x2), region = 71 }

</bundles_post_ra>
